<compile_context>
chip_gen: v5e
topology: v5e:2x2
jax: 0.10.0
libtpu: 0.0.40
codegen_flags: <defaults>
</compile_context>

<pallas_src>
import math

import jax
import jax.numpy as jnp
from jax.experimental import pallas as pl
from jax.experimental.pallas import tpu as pltpu

_INV_SQRT2 = 1.0 / math.sqrt(2.0)


def highway_kernel(x_ref, w_ref, b_ref, o_ref):
    # x_ref: (TM, F); w_ref: (F, 2F) = [W_nl | W_gate]; b_ref: (1, 2F) f32;
    # o_ref: (TM, F)
    x = x_ref[...]
    f = x_ref.shape[1]

    # Single fused matmul for both paths, f32 accumulation on the MXU.
    y = jnp.dot(x, w_ref[...], preferred_element_type=jnp.float32)
    y = y + b_ref[...]                      # bias already f32

    nl = y[:, :f]                           # non-linear pre-activation
    g = y[:, f:]                            # gate pre-activation

    # Exact (erf-based) GELU, matching PyTorch nn.GELU() default.
    nl = 0.5 * nl * (1.0 + jax.lax.erf(nl * jnp.float32(_INV_SQRT2)))
    # Sigmoid gate (EUP).
    g = jax.nn.sigmoid(g)

    xf = x.astype(jnp.float32)
    # Highway combine: gate*nl + (1-gate)*x  ==  x + gate*(nl - x)
    o_ref[...] = (xf + g * (nl - xf)).astype(o_ref.dtype)


def _pick_row_tile(batch):
    # Largest tile (<= 256 rows) that divides the batch and keeps the sublane
    # dim a multiple of 8; otherwise fall back to one full-extent block.
    for cand in (256, 128, 64, 32, 16, 8):
        if batch % cand == 0:
            return cand
    return batch


def highway_cell(x, w_nl, b_nl, w_gate, b_gate):
    """x: (B, F); w_*: (F, F) laid out (in, out); b_*: (F,)."""
    B, F = x.shape

    # Fuse the two linears: one (F, 2F) weight block, one (1, 2F) f32 bias.
    w_cat = jnp.concatenate([w_nl, w_gate], axis=1)
    b_cat = jnp.concatenate([b_nl, b_gate]).astype(jnp.float32).reshape(1, 2 * F)

    tm = _pick_row_tile(B)
    grid = (pl.cdiv(B, tm),)

    itemsize = x.dtype.itemsize
    w_bytes = w_cat.size * w_cat.dtype.itemsize + b_cat.size * b_cat.dtype.itemsize
    # Resident weights/bias (double-buffered by the pipeline) + double-buffered
    # x/out tiles + f32 intermediates + headroom; cap at 32 MiB (safe on v7x).
    vmem_bytes = (2 * w_bytes
                  + 4 * tm * F * itemsize          # x + out tiles, 2 buffers each
                  + 4 * tm * 2 * F * 4             # f32 matmul-result intermediates
                  + (4 << 20))
    vmem_limit = int(min(max(vmem_bytes, 8 << 20), 32 << 20))

    cost = pl.CostEstimate(
        flops=2 * B * F * (2 * F),
        transcendentals=2 * B * F,                 # one erf + one sigmoid per element
        bytes_accessed=2 * x.size * itemsize + w_bytes,
    )

    return pl.pallas_call(
        highway_kernel,
        out_shape=jax.ShapeDtypeStruct((B, F), x.dtype),
        grid=grid,
        in_specs=[
            pl.BlockSpec((tm, F), lambda i: (i, 0)),       # x: streamed over batch
            pl.BlockSpec((F, 2 * F), lambda i: (0, 0)),    # fused weights: resident
            pl.BlockSpec((1, 2 * F), lambda i: (0, 0)),    # fused bias: resident
        ],
        out_specs=pl.BlockSpec((tm, F), lambda i: (i, 0)),
        compiler_params=pltpu.CompilerParams(
            dimension_semantics=("parallel",),
            vmem_limit_bytes=vmem_limit,
        ),
        cost_estimate=cost,
    )(x, w_cat, b_cat)


def reference_highway(x, w_nl, b_nl, w_gate, b_gate):
    nl = jax.nn.gelu(x @ w_nl + b_nl, approximate=False)
    g = jax.nn.sigmoid(x @ w_gate + b_gate)
    return g * nl + (1.0 - g) * x


if __name__ == "__main__":
    key = jax.random.PRNGKey(0)
    k_x, k_wn, k_bn, k_wg, k_bg = jax.random.split(key, 5)

    # Small shapes consistent with the module: batch=16, in_features=32.
    B, F = 16, 32

    # Deterministic init (mimics PyTorch Linear uniform(-1/sqrt(F), 1/sqrt(F))).
    bound = 1.0 / math.sqrt(F)
    x = jax.random.normal(k_x, (B, F), dtype=jnp.float32)
    w_nl = jax.random.uniform(k_wn, (F, F), jnp.float32, -bound, bound)
    b_nl = jax.random.uniform(k_bn, (F,), jnp.float32, -bound, bound)
    w_gate = jax.random.uniform(k_wg, (F, F), jnp.float32, -bound, bound)
    b_gate = jax.random.uniform(k_bg, (F,), jnp.float32, -bound, bound)

    out = highway_cell(x, w_nl, b_nl, w_gate, b_gate)
    out = jax.block_until_ready(out)

    ref = reference_highway(x, w_nl, b_nl, w_gate, b_gate)
    assert out.shape == (B, F)
    assert jnp.allclose(out, ref, atol=2e-5, rtol=2e-5), "mismatch vs JAX reference"

    print("KERNEL_OK")
</pallas_src>

<mosaic_0001>
module attributes {stable_mosaic.version = 11 : i64} {
  func.func @highway_kernel(%arg0: i32, %arg1: memref<16x32xf32, #tpu.memory_space<vmem>>, %arg2: memref<32x64xf32, #tpu.memory_space<vmem>>, %arg3: memref<1x64xf32, #tpu.memory_space<vmem>>, %arg4: memref<16x32xf32, #tpu.memory_space<vmem>>) attributes {dimension_semantics = [#tpu.dimension_semantics<parallel>], iteration_bounds = array<i64: 1>, scalar_prefetch = 0 : i64, scratch_operands = 0 : i64, tpu.core_type = #tpu.core_type<tc>, window_params = [{transform_indices = @transform_0, window_bounds = array<i64: 16, 32>}, {pipeline_mode = #tpu.pipeline_mode<synchronous>, transform_indices = @transform_1, window_bounds = array<i64: 32, 64>}, {pipeline_mode = #tpu.pipeline_mode<synchronous>, transform_indices = @transform_2, window_bounds = array<i64: 1, 64>}, {transform_indices = @transform_3, window_bounds = array<i64: 16, 32>}]} {
    %c0 = arith.constant 0 : index
    %c0_0 = arith.constant 0 : index
    %0 = vector.load %arg1[%c0, %c0_0] : memref<16x32xf32, #tpu.memory_space<vmem>>, vector<16x32xf32>
    %c0_1 = arith.constant 0 : index
    %c0_2 = arith.constant 0 : index
    %1 = vector.load %arg2[%c0_1, %c0_2] : memref<32x64xf32, #tpu.memory_space<vmem>>, vector<32x64xf32>
    %cst = arith.constant dense<0.000000e+00> : vector<16x64xf32>
    %2 = tpu.matmul %0, %1, %cst {dimension_numbers = #tpu.dot_dimension_numbers<[1], [0], [0], [1], [0, 0, 1, 1], [], []>} : vector<16x32xf32>, vector<32x64xf32>, vector<16x64xf32> -> vector<16x64xf32>
    %c0_3 = arith.constant 0 : index
    %c0_4 = arith.constant 0 : index
    %3 = vector.load %arg3[%c0_3, %c0_4] : memref<1x64xf32, #tpu.memory_space<vmem>>, vector<1x64xf32>
    %4 = vector.broadcast %3 : vector<1x64xf32> to vector<16x64xf32>
    %5 = arith.addf %2, %4 : vector<16x64xf32>
    %6 = vector.extract_strided_slice %5 {offsets = [0, 0], sizes = [16, 32], strides = [1, 1]} : vector<16x64xf32> to vector<16x32xf32>
    %7 = vector.extract_strided_slice %5 {offsets = [0, 32], sizes = [16, 32], strides = [1, 1]} : vector<16x64xf32> to vector<16x32xf32>
    %cst_5 = arith.constant 5.000000e-01 : f32
    %8 = vector.broadcast %cst_5 : f32 to vector<16x32xf32>
    %9 = arith.mulf %8, %6 : vector<16x32xf32>
    %cst_6 = arith.constant 0.707106769 : f32
    %10 = vector.broadcast %cst_6 : f32 to vector<16x32xf32>
    %11 = arith.mulf %6, %10 : vector<16x32xf32>
    %12 = math.erf %11 : vector<16x32xf32>
    %cst_7 = arith.constant 1.000000e+00 : f32
    %13 = vector.broadcast %cst_7 : f32 to vector<16x32xf32>
    %14 = arith.addf %13, %12 : vector<16x32xf32>
    %15 = arith.mulf %9, %14 : vector<16x32xf32>
    %16 = arith.negf %7 : vector<16x32xf32>
    %17 = math.exp %16 : vector<16x32xf32>
    %cst_8 = arith.constant 1.000000e+00 : f32
    %18 = vector.broadcast %cst_8 : f32 to vector<16x32xf32>
    %19 = arith.addf %18, %17 : vector<16x32xf32>
    %20 = arith.divf %18, %19 : vector<16x32xf32>
    %21 = arith.subf %15, %0 : vector<16x32xf32>
    %22 = arith.mulf %20, %21 : vector<16x32xf32>
    %23 = arith.addf %0, %22 : vector<16x32xf32>
    %c0_9 = arith.constant 0 : index
    %c0_10 = arith.constant 0 : index
    %24 = vector.load %arg4[%c0_9, %c0_10] : memref<16x32xf32, #tpu.memory_space<vmem>>, vector<16x32xf32>
    tpu.vector_store %arg4[%c0_9, %c0_10], %23 {strides = array<i32>} : memref<16x32xf32, #tpu.memory_space<vmem>>, vector<16x32xf32>,
    return
  }
  func.func @transform_0(%arg0: i32) -> (i32, i32) {
    %c0_i32 = arith.constant 0 : i32
    %c0_i32_0 = arith.constant 0 : i32
    return %arg0, %c0_i32 : i32, i32
  }
  func.func @transform_1(%arg0: i32) -> (i32, i32) {
    %c0_i32 = arith.constant 0 : i32
    %c0_i32_0 = arith.constant 0 : i32
    %c0_i32_1 = arith.constant 0 : i32
    return %c0_i32, %c0_i32_0 : i32, i32
  }
  func.func @transform_2(%arg0: i32) -> (i32, i32) {
    %c0_i32 = arith.constant 0 : i32
    %c0_i32_0 = arith.constant 0 : i32
    %c0_i32_1 = arith.constant 0 : i32
    return %c0_i32, %c0_i32_0 : i32, i32
  }
  func.func @transform_3(%arg0: i32) -> (i32, i32) {
    %c0_i32 = arith.constant 0 : i32
    %c0_i32_0 = arith.constant 0 : i32
    return %arg0, %c0_i32 : i32, i32
  }
}

</mosaic_0001>

<bundles_post_ra>
// kernel: tpu_custom_call.1
= control target key start
LH: loop header
LB: loop body
LE: loop exit
PB: predicated region body
PF: predicated region fallthrough
CT: control target
= control target key end

     0   :  { %8 = vsyncpa [#allocation3], 0  ;;  %s447_s0 = inlined_call_operand.hbm [shape: f32[16,32], index: 0, kind: input, shape index: {}]   ;;  %s448_s1 = inlined_call_operand.hbm [shape: f32[32,64], index: 1, kind: input, shape index: {}]   ;;  %s449_s2 = inlined_call_operand.vmem [shape: f32[1,64], index: 2, kind: input, shape index: {}]   ;;  %s450_s3 = inlined_call_operand.hbm [shape: f32[16,32], index: 3, kind: output, shape index: {}]  }
   0x1   :  { %9 = vsyncpa [#allocation6], 0 }
   0x2   :  { %10 = vsyncpa [#allocation4], 0  ;;  %s15_s14 = sshll.u32 %s447_s0, 4  ;;  %s365_s15 = smov [#allocation2]   ;;  %s16_s14 = int_to_ptr.hbm [resolvable:$true] %s15_s14 }
   0x3   :  { %s17_s16 = sshll.u32 %s365_s15, 4  ;;  %s28_s19 = sshll.u32 %s448_s1, 4  ;;  %s18_s16 = int_to_ptr.vmem [resolvable:$true] %s17_s16  ;;  %s29_s19 = int_to_ptr.hbm [resolvable:$true] %s28_s19 }
   0x4   :  { %s366_s20 = smov 128   ;;  %s367_s21 = smov 8  }
   0x5   :  { %23 = dma.hbm_to_vmem [thread:$0]  %s16_s14, 256, %s18_s16, [#allocation3], %s366_s20, %s366_s20, %s367_s21  }
   0x6   :  { %s368_s22 = smov [#allocation5]  }
   0x7   :  { %s30_s23 = sshll.u32 %s368_s22, 4  ;;  %s31_s23 = int_to_ptr.vmem [resolvable:$true] %s30_s23 }
   0x8   :  { %36 = dma.hbm_to_vmem [thread:$0]  %s29_s19, 512, %s31_s23, [#allocation6], %s366_s20, %s366_s20, %s367_s21  }
   0x9   :  { %359 = dma.done.wait [#allocation3], 256  }
   0xa   :  { %360 = vsyncadd [#allocation3], 4294967040 }
   0xb   :  { %361 = dma.done.wait [#allocation6], 512  }
   0xc   :  { %362 = vsyncadd [#allocation6], 4294966784  ;;  %v52_v0 = vld [vmem:[#allocation5 + $0x18] sm:$0xff]  ;;  %v51_v1 = vld [vmem:[#allocation5 + $0x10] sm:$0xff]  ;;  %vm57_vm0 = vcmask 261120   ;;  %s370_s24 = smov 96  }
   0xd   :  { %76 = vmatpush.msra.mxu0 %v52_v0  ;;  %263 = vmatpush.msra.mxu1 %v52_v0  ;;  %v50_v2 = vld [vmem:[#allocation5 + $0x8] sm:$0xff]  ;;  %v49_v3 = vld [vmem:[#allocation5] sm:$0xff]  ;;  %v404_v4 = vld [vmem:[#allocation2] sm:$0xff]  ;;  %s371_s25 = smov [#allocation7]   ;;  %s243_s29 = sshll.u32 %s450_s3, 4  ;;  %s244_s29 = int_to_ptr.hbm [resolvable:$true] %s243_s29 }
   0xe   :  { %v406_v5 = vld [vmem:[#allocation2 + $0x8] sm:$0xff]  ;;  %v274_v6 = vld [vmem:[%s449_s2] ss:$0 sm:$0xff]  ;;  %s369_s2 = smov 32   ;;  %s241_s26 = sshll.u32 %s371_s25, 4  ;;  %s242_s26 = int_to_ptr.vmem [resolvable:$true] %s241_s26 }
   0xf   :  { %77 = vmatpush.msra.mxu0 %v51_v1  ;;  %264 = vmatpush.msra.mxu1 %v51_v1 }
  0x11   :  { %78 = vmatpush.msra.mxu0 %v50_v2  ;;  %265 = vmatpush.msra.mxu1 %v50_v2 }
  0x13   :  { %79 = vmatpush.msra.mxu0 %v49_v3  ;;  %266 = vmatpush.msra.mxu1 %v49_v3 }
  0x14   :  { %257 = vmatmul.msk.f32.vlgmr.msra.gmra.mxu0 %vm57_vm0, %v404_v4  ;;  %258 = vmatmul.msk.f32.vlgmr.msra.gmra.mxu1 %vm57_vm0, %v406_v5 }
  0x91   :  { %v81_v7 = vpop.f32.mrf.mxu0  ;;  %v84_v8 = vpop.f32.mrf.mxu1 }
  0x92   :  { %v415_v9 = vadd.f32 %v274_v6, %v81_v7  ;;  %v417_v10 = vadd.f32 %v274_v6, %v84_v8 }
  0x94   :  { %v420_v11 = vmul.f32 0.70710677, %v415_v9  ;;  %v423_v12 = vmul.f32 0.70710677, %v417_v10 }
  0x96   :  { %v91_v13 = vmul.f32 %v420_v11, %v420_v11  ;;  %v131_v14 = vmul.f32 %v423_v12, %v423_v12 }
  0x98   :  { %v92_v15 = vmin.f32 %v91_v13, 16.0  ;;  %v132_v16 = vmin.f32 %v131_v14, 16.0 }
  0x9a   :  { %v93_v17 = vmul.f32 2.1237322e-06, %v92_v15  ;;  %v104_v18 = vmul.f32 3.8918573e-05, %v92_v15  ;;  %v133_v19 = vmul.f32 2.1237322e-06, %v132_v16 }
  0x9b   :  { %v144_v20 = vmul.f32 3.8918573e-05, %v132_v16 }
  0x9c   :  { %v94_v21 = vadd.f32 0.00028619796, %v93_v17  ;;  %v105_v22 = vadd.f32 0.001143296, %v104_v18  ;;  %v134_v23 = vadd.f32 0.00028619796, %v133_v19 }
  0x9d   :  { %v145_v24 = vadd.f32 0.001143296, %v144_v20 }
  0x9e   :  { %v95_v25 = vmul.f32 %v94_v21, %v92_v15  ;;  %v106_v26 = vmul.f32 %v105_v22, %v92_v15  ;;  %v135_v27 = vmul.f32 %v134_v23, %v132_v16 }
  0x9f   :  { %v146_v28 = vmul.f32 %v145_v24, %v132_v16  ;;  %v87_v24 = vmul.f32 0.5, %v415_v9 }
  0xa0   :  { %v96_v29 = vadd.f32 0.0036580483, %v95_v25  ;;  %v107_v30 = vadd.f32 0.014752088, %v106_v26  ;;  %v136_v32 = vadd.f32 0.0036580483, %v135_v27 }
  0xa1   :  { %v147_v31 = vadd.f32 0.014752088, %v146_v28 }
  0xa2   :  { %v108_v33 = vmul.f32 %v107_v30, %v92_v15  ;;  %v97_v35 = vmul.f32 %v96_v29, %v92_v15  ;;  %v137_v38 = vmul.f32 %v136_v32, %v132_v16  ;;  %v88_v29 = vmul.f32 0.5, %v417_v10 }
  0xa3   :  { %v148_v34 = vmul.f32 %v147_v31, %v132_v16  ;;  %v261_v31 = vmul.f32 -1.442695, %v415_v9  ;;  %v262_v32 = vmul.f32 -1.442695, %v417_v10 }
  0xa4   :  { %v109_v36 = vadd.f32 0.112945676, %v108_v33  ;;  %v98_v41 = vadd.f32 0.05243302, %v97_v35  ;;  %v138_v44 = vadd.f32 0.05243302, %v137_v38 }
  0xa5   :  { %v149_v37 = vadd.f32 0.112945676, %v148_v34 }
  0xa6   :  { %v110_v39 = vmul.f32 %v109_v36, %v92_v15  ;;  %v99_v47 = vmul.f32 %v98_v41, %v92_v15  ;;  %v139_v50 = vmul.f32 %v138_v44, %v132_v16 }
  0xa7   :  { %v150_v40 = vmul.f32 %v149_v37, %v132_v16 }
  0xa8   :  { %v111_v42 = vadd.f32 0.4994258, %v110_v39  ;;  %v100_v51 = vadd.f32 0.18741608, %v99_v47  ;;  %v140_v52 = vadd.f32 0.18741608, %v139_v50 }
  0xa9   :  { %v151_v43 = vadd.f32 0.4994258, %v150_v40 }
  0xaa   :  { %v112_v45 = vmul.f32 %v111_v42, %v92_v15  ;;  %v101_v54 = vmul.f32 %v100_v51, %v92_v15  ;;  %v141_v57 = vmul.f32 %v140_v52, %v132_v16 }
  0xab   :  { %v152_v46 = vmul.f32 %v151_v43, %v132_v16 }
  0xac   :  { %v113_v48 = vadd.f32 1.0, %v112_v45  ;;  %v102_v60 = vadd.f32 1.1283791, %v101_v54  ;;  %v142_v2 = vadd.f32 1.1283791, %v141_v57 }
  0xad   :  { %v153_v49 = vadd.f32 1.0, %v152_v46 }
  0xae   :  { %275 = vrcp.f32 %v113_v48  ;;  %v125_v61 = vand.u32 2147483648, %v113_v48  ;;  %v123_v0 = vand.u32 2147483647, %v113_v48  ;;  %vm119_vm3 = vweird.f32 %v113_v48 }
  0xaf   :  { %277 = vrcp.f32 %v153_v49  ;;  %v165_v1 = vand.u32 2147483648, %v153_v49  ;;  %v163_v6 = vand.u32 2147483647, %v153_v49  ;;  %vm159_vm5 = vweird.f32 %v153_v49 }
  0xb0   :  { %v126_v8 = vor.u32 1.1754944e-38, %v125_v61  ;;  %v103_v14 = vmul.f32 %v102_v60, %v420_v11  ;;  %vm124_vm6 = vcmp.eq.f32.partialorder %v123_v0, 8.507059e+37  ;;  %v143_v17 = vmul.f32 %v142_v2, %v423_v12 }
  0xb1   :  { %v166_v16 = vor.u32 1.1754944e-38, %v165_v1  ;;  %vm164_vm8 = vcmp.eq.f32.partialorder %v163_v6, 8.507059e+37  ;;  %279 = vpow2.f32 %v261_v31 }
  0xb2   :  { %281 = vpow2.f32 %v262_v32 }
  0xb4   :  { %v276_v53 = vpop.eup %275 }
  0xb5   :  { %v278_v55 = vpop.eup %277  ;;  %v115_v56 = vmul.f32 %v276_v53, %v113_v48  ;;  %vm120_vm1 = vweird.f32 %v276_v53 }
  0xb6   :  { %v155_v58 = vmul.f32 %v278_v55, %v153_v49  ;;  %vm160_vm2 = vweird.f32 %v278_v55  ;;  %vm121_vm4 = vmor %vm119_vm3, %vm120_vm1 }
  0xb7   :  { %v116_v59 = vsub.f32 1.0, %v115_v56  ;;  %vm161_vm7 = vmor %vm159_vm5, %vm160_vm2  ;;  %v280_v33 = vpop.eup %279 }
  0xb8   :  { %v156_v62 = vsub.f32 1.0, %v155_v58  ;;  %v181_v34 = vadd.f32 1.0, %v280_v33  ;;  %v282_v35 = vpop.eup %281 }
  0xb9   :  { %v117_v63 = vmul.f32 %v276_v53, %v116_v59  ;;  %v182_v36 = vadd.f32 1.0, %v282_v35 }
  0xba   :  { %v157_v3 = vmul.f32 %v278_v55, %v156_v62  ;;  %283 = vrcp.f32 %v181_v34  ;;  %v194_v9 = vand.u32 2147483648, %v181_v34  ;;  %vm188_vm10 = vweird.f32 %v181_v34 }
  0xbb   :  { %v118_v7 = vadd.f32 %v276_v53, %v117_v63  ;;  %285 = vrcp.f32 %v182_v36  ;;  %v192_v45 = vand.u32 2147483647, %v181_v34  ;;  %vm203_vm13 = vweird.f32 %v182_v36 }
  0xbc   :  { %v158_v13 = vadd.f32 %v278_v55, %v157_v3  ;;  %v195_v47 = vor.u32 1.1754944e-38, %v194_v9  ;;  %v209_v52 = vand.u32 2147483648, %v182_v36 }
  0xbd   :  { %v122_v15 = vsel %vm121_vm4, %v276_v53, %v118_v7  ;;  %vm193_vm12 = vcmp.eq.f32.partialorder %v192_v45, 8.507059e+37  ;;  %v207_v53 = vand.u32 2147483647, %v182_v36 }
  0xbe   :  { %v127_v18 = vsel %vm124_vm6, %v126_v8, %v122_v15  ;;  %v162_v19 = vsel %vm161_vm7, %v278_v55, %v158_v13  ;;  %v210_v55 = vor.u32 1.1754944e-38, %v209_v52 }
  0xbf   :  { %v128_v20 = vmul.f32 %v127_v18, %v103_v14  ;;  %v167_v21 = vsel %vm164_vm8, %v166_v16, %v162_v19  ;;  %vm208_vm1 = vcmp.eq.f32.partialorder %v207_v53, 8.507059e+37 }
  0xc0   :  { %v168_v22 = vmul.f32 %v167_v21, %v143_v17  ;;  %v284_v37 = vpop.eup %283 }
  0xc1   :  { %v259_v23 = vclamps-f32 %v128_v20, 1.0  ;;  %v184_v38 = vmul.f32 %v284_v37, %v181_v34  ;;  %v286_v40 = vpop.eup %285  ;;  %vm189_vm9 = vweird.f32 %v284_v37 }
  0xc2   :  { %v260_v26 = vclamps-f32 %v168_v22, 1.0  ;;  %v199_v42 = vmul.f32 %v286_v40, %v182_v36  ;;  %vm190_vm11 = vmor %vm188_vm10, %vm189_vm9  ;;  %vm204_vm14 = vweird.f32 %v286_v40 }
  0xc3   :  { %v171_v25 = vadd.f32 1.0, %v259_v23  ;;  %v185_v39 = vsub.f32 1.0, %v184_v38  ;;  %vm205_vm15 = vmor %vm203_vm13, %vm204_vm14 }
  0xc4   :  { %v172_v28 = vadd.f32 1.0, %v260_v26  ;;  %v200_v44 = vsub.f32 1.0, %v199_v42 }
  0xc5   :  { %v173_v27 = vmul.f32 %v171_v25, %v87_v24  ;;  %v186_v41 = vmul.f32 %v284_v37, %v185_v39 }
  0xc6   :  { %v174_v12 = vmul.f32 %v172_v28, %v88_v29  ;;  %v201_v46 = vmul.f32 %v286_v40, %v200_v44 }
  0xc7   :  { %v213_v11 = vsub.f32 %v173_v27, %v404_v4  ;;  %v187_v43 = vadd.f32 %v284_v37, %v186_v41 }
  0xc8   :  { %v214_v30 = vsub.f32 %v174_v12, %v406_v5  ;;  %v202_v51 = vadd.f32 %v286_v40, %v201_v46 }
  0xc9   :  { %217 = vrot.lane.b32.xlu0 %v213_v11, %s369_s2  ;;  %v191_v10 = vsel %vm190_vm11, %v284_v37, %v187_v43 }
  0xca   :  { %v196_v48 = vsel %vm193_vm12, %v195_v47, %v191_v10  ;;  %v206_v54 = vsel %vm205_vm15, %v286_v40, %v202_v51 }
  0xcb   :  { %v211_v56 = vsel %vm208_vm1, %v210_v55, %v206_v54 }
  0xd1   :  { %219 = vrot.lane.b32.xlu0 %v214_v30, %s369_s2 }
 0x13b   :  { %v218_v49 = vpop.permute.xlu0 %217 }
 0x13c   :  { %v223_v50 = vmul.f32 %v218_v49, %v196_v48 }
 0x13e   :  { %227 = vrot.lane.b32.xlu1 %v223_v50, %s370_s24 }
 0x143   :  { %v220_v57 = vpop.permute.xlu0 %219 }
 0x144   :  { %v224_v58 = vmul.f32 %v220_v57, %v211_v56 }
 0x146   :  { %229 = vrot.lane.b32.xlu1 %v224_v58, %s370_s24 }
 0x1b0   :  { %v228_v59 = vpop.permute.xlu1 %227 }
 0x1b1   :  { %v233_v60 = vadd.f32 %v228_v59, %v404_v4 }
 0x1b3   :  { %235 = vst.msk [vmem:[#allocation7] sm:$0xff] %vm57_vm0, %v233_v60 }
 0x1b8   :  { %v230_v61 = vpop.permute.xlu1 %229 }
 0x1b9   :  { %v234_v62 = vadd.f32 %v230_v61, %v406_v5 }
 0x1bb   :  { %236 = vst.msk [vmem:[#allocation7 + $0x8] sm:$0xff] %vm57_vm0, %v234_v62 }
 0x1bc   :  { %249 = dma.vmem_to_hbm [thread:$0]  %s242_s26, 256, %s244_s29, [#allocation4], %s366_s20, %s366_s20, %s367_s21  }
 0x1bd   :  { %363 = dma.done.wait [#allocation4], 256  }
 0x1be   :  { %364 = vsyncadd [#allocation4], 4294967040 }
 0x1bf   :  { %254 = vsyncpa [#allocation3], 1 }
 0x1c0   :  { %255 = vsyncpa [#allocation6], 1 }
 0x1c1   :  { %256 = vsyncpa [#allocation4], 1 }

</bundles_post_ra>
